<compile_context>
chip_gen: v7x
topology: tpu7x:2x2x1
jax: 0.10.0
libtpu: 0.0.40
codegen_flags: <defaults>
</compile_context>

<pallas_src>
import functools

import jax
import jax.numpy as jnp
from jax import lax
from jax.experimental import pallas as pl
from jax.experimental.pallas import tpu as pltpu

NEG_FILTER_SLACK = 0.05   # keep negatives with sim > min_pos - 0.05
POS_BETA = 2.0
NEG_BETA = 50.0
NEG_WEIGHT = 0.04


def _stable_softplus(z):
    # log(1 + exp(z)) without overflow: max(z,0) + log1p(exp(-|z|))
    return jnp.maximum(z, 0.0) + jnp.log1p(jnp.exp(-jnp.abs(z)))


def _fused_branch_kernel(w_pos_ref, neg_ref, x_ref, out_ref, *, margin):
    """One grid step == one feature branch.

    w_pos_ref : (N, N) f32  positive-pair weights, pre-normalized per anchor row
    neg_ref   : (N, N) f32  1.0 where labels differ, else 0.0
    x_ref     : (1, N, Dpad) features for this branch (zero lane-padded)
    out_ref   : (1, 8, 128)  lane-dense slab; loss broadcast into it
    """
    x = x_ref[0].astype(jnp.float32)                     # (N, Dpad)
    n = x.shape[0]

    # similarity matrix on the MXU, contracting lane-vs-lane (no explicit x.T)
    sim = lax.dot_general(x, x, (((1,), (1,)), ((), ())),
                          preferred_element_type=jnp.float32)   # (N, N)

    w_pos = w_pos_ref[...]                               # (N, N) f32
    neg_f = neg_ref[...]                                 # (N, N) f32
    pos_b = w_pos > 0.0

    # hardest (smallest similarity) positive per anchor == torch.sort(pos_pair)[0][0]
    min_pos = jnp.min(jnp.where(pos_b, sim, jnp.inf), axis=1, keepdims=True)  # (N,1)

    # negatives surviving the hard-mining filter
    keep = jnp.where(sim > (min_pos - NEG_FILTER_SLACK), neg_f, 0.0)          # (N,N)
    neg_cnt = jnp.sum(keep, axis=1, keepdims=True)                            # (N,1)

    # positive loss: mask already row-normalized -> single weighted reduction
    pos_loss = jnp.sum(w_pos * _stable_softplus(-POS_BETA * (sim - margin)),
                       axis=1, keepdims=True)                                 # (N,1)

    neg_sum = jnp.sum(keep * _stable_softplus(NEG_BETA * (sim - margin)),
                      axis=1, keepdims=True)                                  # (N,1)
    neg_loss = (NEG_WEIGHT * neg_sum
                * pl.reciprocal(jnp.maximum(neg_cnt, 1.0), approx=True))

    # anchors with no surviving negative (torch's `c += 1; continue`) contribute 0
    per_anchor = jnp.where(neg_cnt > 0.0, pos_loss + neg_loss, 0.0)           # (N,1)

    loss = jnp.sum(per_anchor) / jnp.float32(n)
    out_ref[...] = jnp.full(out_ref.shape, loss, dtype=out_ref.dtype)


def dist_weight_dev_branch_loss(inputs, targets, *, margin=0.5,
                                position=(0, 170, 341, 512)):
    """Equivalent of DistWeightDevBranchLoss.forward.

    inputs : [N, D] float32 features, D == position[-1]
    targets: [N] int labels
    """
    n, _ = inputs.shape
    num_branches = len(position) - 1
    widths = [position[i + 1] - position[i] for i in range(num_branches)]
    dpad = max(128, ((max(widths) + 127) // 128) * 128)

    # Pad every branch to a common lane width (multiple of 128) and stack:
    # zero lane-padding leaves X @ X.T unchanged.
    chunks = []
    for i in range(num_branches):
        c = inputs[:, position[i]:position[i + 1]].astype(jnp.float32)
        c = jnp.pad(c, ((0, 0), (0, dpad - widths[i])))
        chunks.append(c)
    x_stack = jnp.stack(chunks, axis=0)                  # (B, N, Dpad)

    # Branch-invariant pair masks, computed once on the host graph.
    # NOTE: anchors with no positive pair (singleton label) contribute 0 here;
    # the torch reference would raise on an empty sort instead.
    t = targets.astype(jnp.int32)
    same = t[:, None] == t[None, :]
    diag = jnp.eye(n, dtype=bool)
    pos_mask = jnp.logical_and(same, jnp.logical_not(diag))
    pos_cnt = jnp.sum(pos_mask, axis=1, keepdims=True).astype(jnp.float32)
    w_pos = pos_mask.astype(jnp.float32) / jnp.maximum(pos_cnt, 1.0)   # (N,N)
    neg_f = jnp.logical_not(same).astype(jnp.float32)                  # (N,N)

    kernel = functools.partial(_fused_branch_kernel, margin=float(margin))
    out = pl.pallas_call(
        kernel,
        out_shape=jax.ShapeDtypeStruct((num_branches, 8, 128), jnp.float32),
        grid_spec=pltpu.PrefetchScalarGridSpec(
            num_scalar_prefetch=0,
            grid=(num_branches,),
            in_specs=[
                # grid-invariant masks: constant block index -> fetched once
                pl.BlockSpec((n, n), lambda b: (0, 0)),
                pl.BlockSpec((n, n), lambda b: (0, 0)),
                # per-branch feature slab
                pl.BlockSpec((1, n, dpad), lambda b: (b, 0, 0)),
            ],
            out_specs=pl.BlockSpec((1, 8, 128), lambda b: (b, 0, 0)),
        ),
        compiler_params=pltpu.CompilerParams(
            dimension_semantics=("parallel",)),
    )(w_pos, neg_f, x_stack)

    # torch.mean(torch.cat(loss_list))
    return jnp.mean(out[:, 0, 0])


def _reference_loss(inputs, targets, *, margin, position):
    """Pure-JAX mirror of the kernel math (for a sanity check)."""
    n = inputs.shape[0]
    t = targets.astype(jnp.int32)
    same = t[:, None] == t[None, :]
    diag = jnp.eye(n, dtype=bool)
    pos_mask = jnp.logical_and(same, jnp.logical_not(diag))
    neg_mask = jnp.logical_not(same)

    losses = []
    for i in range(len(position) - 1):
        x = inputs[:, position[i]:position[i + 1]].astype(jnp.float32)
        sim = x @ x.T
        min_pos = jnp.min(jnp.where(pos_mask, sim, jnp.inf), axis=1, keepdims=True)
        keep = jnp.logical_and(neg_mask, sim > (min_pos - NEG_FILTER_SLACK))
        pos_cnt = jnp.sum(pos_mask, axis=1, keepdims=True).astype(jnp.float32)
        neg_cnt = jnp.sum(keep, axis=1, keepdims=True).astype(jnp.float32)
        pos_terms = jnp.where(pos_mask, jnp.log1p(jnp.exp(-POS_BETA * (sim - margin))), 0.0)
        neg_terms = jnp.where(keep, jnp.log1p(jnp.exp(NEG_BETA * (sim - margin))), 0.0)
        pos_loss = jnp.sum(pos_terms, axis=1, keepdims=True) / jnp.maximum(pos_cnt, 1.0)
        neg_loss = NEG_WEIGHT * jnp.sum(neg_terms, axis=1, keepdims=True) / jnp.maximum(neg_cnt, 1.0)
        per_anchor = jnp.where(neg_cnt > 0.0, pos_loss + neg_loss, 0.0)
        losses.append(jnp.sum(per_anchor) / n)
    return jnp.mean(jnp.stack(losses))


if __name__ == "__main__":
    key = jax.random.PRNGKey(0)

    # Small, module-consistent shapes: batch N=8 (4 identities x 2 samples),
    # feature dim 48 split into 3 branches of width 16 each.
    N = 8
    position = (0, 16, 32, 48)
    D = position[-1]

    x = jax.random.normal(key, (N, D), dtype=jnp.float32)
    x = x / jnp.linalg.norm(x, axis=1, keepdims=True)      # cosine-similarity features
    targets = jnp.array([0, 0, 1, 1, 2, 2, 3, 3], dtype=jnp.int32)

    loss_fn = jax.jit(functools.partial(dist_weight_dev_branch_loss,
                                        margin=0.5, position=position))
    loss = loss_fn(x, targets)
    jax.block_until_ready(loss)

    ref = _reference_loss(x, targets, margin=0.5, position=position)
    assert loss.shape == () and jnp.isfinite(loss)
    assert jnp.allclose(loss, ref, rtol=1e-2, atol=1e-4), (loss, ref)
    print("KERNEL_OK")
</pallas_src>

<mosaic_0001>
module attributes {stable_mosaic.version = 11 : i64} {
  func.func @_fused_branch_kernel(%arg0: i32, %arg1: memref<8x8xf32, #tpu.memory_space<vmem>>, %arg2: memref<8x8xf32, #tpu.memory_space<vmem>>, %arg3: memref<1x8x128xf32, #tpu.memory_space<vmem>>, %arg4: memref<1x8x128xf32, #tpu.memory_space<vmem>>) attributes {dimension_semantics = [#tpu.dimension_semantics<parallel>], iteration_bounds = array<i64: 3>, scalar_prefetch = 0 : i64, scratch_operands = 0 : i64, tpu.core_type = #tpu.core_type<tc>, window_params = [{pipeline_mode = #tpu.pipeline_mode<synchronous>, transform_indices = @transform_0, window_bounds = array<i64: 8, 8>}, {pipeline_mode = #tpu.pipeline_mode<synchronous>, transform_indices = @transform_1, window_bounds = array<i64: 8, 8>}, {transform_indices = @transform_2, window_bounds = array<i64: 1, 8, 128>}, {transform_indices = @transform_3, window_bounds = array<i64: 1, 8, 128>}]} {
    %c0 = arith.constant 0 : index
    %c0_0 = arith.constant 0 : index
    %c0_1 = arith.constant 0 : index
    %0 = vector.load %arg3[%c0, %c0_0, %c0_1] : memref<1x8x128xf32, #tpu.memory_space<vmem>>, vector<1x8x128xf32>
    %1 = vector.shape_cast %0 : vector<1x8x128xf32> to vector<8x128xf32>
    %cst = arith.constant dense<0.000000e+00> : vector<8x8xf32>
    %2 = tpu.matmul %1, %1, %cst {dimension_numbers = #tpu.dot_dimension_numbers<[1], [1], [0], [0], [0, 0, 1, 0], [], []>} : vector<8x128xf32>, vector<8x128xf32>, vector<8x8xf32> -> vector<8x8xf32>
    %c0_2 = arith.constant 0 : index
    %c0_3 = arith.constant 0 : index
    %3 = vector.load %arg1[%c0_2, %c0_3] : memref<8x8xf32, #tpu.memory_space<vmem>>, vector<8x8xf32>
    %c0_4 = arith.constant 0 : index
    %c0_5 = arith.constant 0 : index
    %4 = vector.load %arg2[%c0_4, %c0_5] : memref<8x8xf32, #tpu.memory_space<vmem>>, vector<8x8xf32>
    %cst_6 = arith.constant 0.000000e+00 : f32
    %5 = vector.broadcast %cst_6 : f32 to vector<8x8xf32>
    %6 = arith.cmpf ogt, %3, %5 : vector<8x8xf32>
    %cst_7 = arith.constant 0x7F800000 : f32
    %7 = vector.broadcast %cst_7 : f32 to vector<8x8xf32>
    %8 = arith.select %6, %2, %7 : vector<8x8xi1>, vector<8x8xf32>
    %cst_8 = arith.constant dense<0x7F800000> : vector<8xf32>
    %9 = vector.multi_reduction <minimumf>, %8, %cst_8 [1] : vector<8x8xf32> to vector<8xf32>
    %10 = vector.shape_cast %9 : vector<8xf32> to vector<8x1xf32>
    %cst_9 = arith.constant 5.000000e-02 : f32
    %11 = vector.broadcast %cst_9 : f32 to vector<8x1xf32>
    %12 = arith.subf %10, %11 : vector<8x1xf32>
    %13 = vector.broadcast %12 : vector<8x1xf32> to vector<8x8xf32>
    %14 = arith.cmpf ogt, %2, %13 : vector<8x8xf32>
    %cst_10 = arith.constant 0.000000e+00 : f32
    %15 = vector.broadcast %cst_10 : f32 to vector<8x8xf32>
    %16 = arith.select %14, %4, %15 : vector<8x8xi1>, vector<8x8xf32>
    %cst_11 = arith.constant dense<0.000000e+00> : vector<8xf32>
    %17 = vector.multi_reduction <add>, %16, %cst_11 [1] : vector<8x8xf32> to vector<8xf32>
    %18 = vector.shape_cast %17 : vector<8xf32> to vector<8x1xf32>
    %cst_12 = arith.constant 5.000000e-01 : f32
    %19 = vector.broadcast %cst_12 : f32 to vector<8x8xf32>
    %20 = arith.subf %2, %19 : vector<8x8xf32>
    %cst_13 = arith.constant -2.000000e+00 : f32
    %21 = vector.broadcast %cst_13 : f32 to vector<8x8xf32>
    %22 = arith.mulf %21, %20 : vector<8x8xf32>
    %cst_14 = arith.constant 0.000000e+00 : f32
    %23 = vector.broadcast %cst_14 : f32 to vector<8x8xf32>
    %24 = arith.maximumf %22, %23 : vector<8x8xf32>
    %25 = math.absf %22 : vector<8x8xf32>
    %cst_15 = arith.constant 0.000000e+00 : f32
    %26 = vector.broadcast %cst_15 : f32 to vector<8x8xf32>
    %27 = arith.subf %26, %25 : vector<8x8xf32>
    %28 = math.exp %27 : vector<8x8xf32>
    %29 = math.log1p %28 : vector<8x8xf32>
    %30 = arith.addf %24, %29 : vector<8x8xf32>
    %31 = arith.mulf %3, %30 : vector<8x8xf32>
    %cst_16 = arith.constant dense<0.000000e+00> : vector<8xf32>
    %32 = vector.multi_reduction <add>, %31, %cst_16 [1] : vector<8x8xf32> to vector<8xf32>
    %33 = vector.shape_cast %32 : vector<8xf32> to vector<8x1xf32>
    %cst_17 = arith.constant 5.000000e-01 : f32
    %34 = vector.broadcast %cst_17 : f32 to vector<8x8xf32>
    %35 = arith.subf %2, %34 : vector<8x8xf32>
    %cst_18 = arith.constant 5.000000e+01 : f32
    %36 = vector.broadcast %cst_18 : f32 to vector<8x8xf32>
    %37 = arith.mulf %36, %35 : vector<8x8xf32>
    %cst_19 = arith.constant 0.000000e+00 : f32
    %38 = vector.broadcast %cst_19 : f32 to vector<8x8xf32>
    %39 = arith.maximumf %37, %38 : vector<8x8xf32>
    %40 = math.absf %37 : vector<8x8xf32>
    %cst_20 = arith.constant 0.000000e+00 : f32
    %41 = vector.broadcast %cst_20 : f32 to vector<8x8xf32>
    %42 = arith.subf %41, %40 : vector<8x8xf32>
    %43 = math.exp %42 : vector<8x8xf32>
    %44 = math.log1p %43 : vector<8x8xf32>
    %45 = arith.addf %39, %44 : vector<8x8xf32>
    %46 = arith.mulf %16, %45 : vector<8x8xf32>
    %cst_21 = arith.constant dense<0.000000e+00> : vector<8xf32>
    %47 = vector.multi_reduction <add>, %46, %cst_21 [1] : vector<8x8xf32> to vector<8xf32>
    %48 = vector.shape_cast %47 : vector<8xf32> to vector<8x1xf32>
    %cst_22 = arith.constant 4.000000e-02 : f32
    %49 = vector.broadcast %cst_22 : f32 to vector<8x1xf32>
    %50 = arith.mulf %49, %48 : vector<8x1xf32>
    %cst_23 = arith.constant 1.000000e+00 : f32
    %51 = vector.broadcast %cst_23 : f32 to vector<8x1xf32>
    %52 = arith.maximumf %18, %51 : vector<8x1xf32>
    %53 = tpu.reciprocal %52 {approx = true} : vector<8x1xf32> -> vector<8x1xf32>
    %54 = arith.mulf %50, %53 : vector<8x1xf32>
    %cst_24 = arith.constant 0.000000e+00 : f32
    %55 = vector.broadcast %cst_24 : f32 to vector<8x1xf32>
    %56 = arith.cmpf ogt, %18, %55 : vector<8x1xf32>
    %57 = arith.addf %33, %54 : vector<8x1xf32>
    %cst_25 = arith.constant 0.000000e+00 : f32
    %58 = vector.broadcast %cst_25 : f32 to vector<8x1xf32>
    %59 = arith.select %56, %57, %58 : vector<8x1xi1>, vector<8x1xf32>
    %60 = vector.shape_cast %59 : vector<8x1xf32> to vector<1x8x1xf32>
    %cst_26 = arith.constant dense<0.000000e+00> : vector<1xf32>
    %61 = vector.multi_reduction <add>, %60, %cst_26 [1, 2] : vector<1x8x1xf32> to vector<1xf32>
    %62 = vector.shape_cast %61 : vector<1xf32> to vector<1x1x1xf32>
    %63 = vector.extract %62[0, 0, 0] : f32 from vector<1x1x1xf32>
    %cst_27 = arith.constant 8.000000e+00 : f32
    %64 = arith.divf %63, %cst_27 : f32
    %65 = vector.broadcast %64 : f32 to vector<1x8x128xf32>
    %c0_28 = arith.constant 0 : index
    %c0_29 = arith.constant 0 : index
    %c0_30 = arith.constant 0 : index
    %66 = vector.load %arg4[%c0_28, %c0_29, %c0_30] : memref<1x8x128xf32, #tpu.memory_space<vmem>>, vector<1x8x128xf32>
    tpu.vector_store %arg4[%c0_28, %c0_29, %c0_30], %65 {strides = array<i32>} : memref<1x8x128xf32, #tpu.memory_space<vmem>>, vector<1x8x128xf32>,
    return
  }
  func.func @transform_0(%arg0: i32) -> (i32, i32) {
    %c0_i32 = arith.constant 0 : i32
    %c0_i32_0 = arith.constant 0 : i32
    %c0_i32_1 = arith.constant 0 : i32
    return %c0_i32, %c0_i32_0 : i32, i32
  }
  func.func @transform_1(%arg0: i32) -> (i32, i32) {
    %c0_i32 = arith.constant 0 : i32
    %c0_i32_0 = arith.constant 0 : i32
    %c0_i32_1 = arith.constant 0 : i32
    return %c0_i32, %c0_i32_0 : i32, i32
  }
  func.func @transform_2(%arg0: i32) -> (i32, i32, i32) {
    %c0_i32 = arith.constant 0 : i32
    %c0_i32_0 = arith.constant 0 : i32
    %c0_i32_1 = arith.constant 0 : i32
    return %arg0, %c0_i32, %c0_i32_0 : i32, i32, i32
  }
  func.func @transform_3(%arg0: i32) -> (i32, i32, i32) {
    %c0_i32 = arith.constant 0 : i32
    %c0_i32_0 = arith.constant 0 : i32
    %c0_i32_1 = arith.constant 0 : i32
    return %arg0, %c0_i32, %c0_i32_0 : i32, i32, i32
  }
}

</mosaic_0001>

<bundles_post_ra>
// kernel: dist_weight_dev_branch_loss.1
= control target key start
LH: loop header
LB: loop body
LE: loop exit
PB: predicated region body
PF: predicated region fallthrough
CT: control target
= control target key end

     0   :  { %s438_s12 = smov 0   ;;  %s472_s0 = inlined_call_operand.vmem [shape: f32[8,8], index: 0, kind: input, shape index: {}]   ;;  %s473_s1 = inlined_call_operand.vmem [shape: f32[8,8], index: 1, kind: input, shape index: {}]   ;;  %s474_s2 = inlined_call_operand.vmem [shape: f32[3,8,128], index: 2, kind: input, shape index: {}]   ;;  %s475_s3 = inlined_call_operand.vmem [shape: f32[3,8,128], index: 3, kind: output, shape index: {}]  }
   0x1 LB: > { %s368_s13 = sadd.s32 4294967295, %s414_s12   ;;  %p372_p0 = scmp.ge.s32.totalorder %s414_s12, 1  ;;  %s414_s12 = sphi %s438_s12, %s13_s12  }
   0x2   : > { %p136_p1 = scmp.lt.s32.totalorder %s414_s12, 4 }
   0x4   : > { %p137_p2 = pnand %p372_p0, %p136_p1 }
   0x5   : > { %p158_p3 = scmp.lt.s32.totalorder (!%p137_p2), %s368_s13, 2  ;;  %v416_v0 = vmov (!%p137_p2), 0.0   ;;  %vm417_vm0 = vmmov (!%p137_p2), 0   ;;  %v237_v2 = vld [vmem:[%s472_s0] sm:$0xff] (!%p137_p2)  ;;  %vm241_vm2 = vcmask (!%p137_p2), 64512   ;;  %vm299_vm6 = vcmask (!%p137_p2), 7168  }
   0x6   : > { %140 = sbr.rel (%p137_p2) target bundleno = 750 (0x2ee), region = 32  ;;  %381 = vmatprep.subr.mxu0 (!%p137_p2), %v416_v0  ;;  %383 = vmatprep.mubr.msk.f32.mxu0 (!%p137_p2), %vm417_vm0, %v416_v0  ;;  %vm239_vm1 = vcmp.gt.f32.partialorder (!%p137_p2), %v237_v2, 0.0  ;;  %v238_v36 = vld [vmem:[%s473_s1] sm:$0xff] (!%p137_p2) }
   0xd   : > { %s477_s13 = smov (!%p158_p3, %s368_s13), 2 }
   0xe   : > { %s373_s14 = sshll.u32 %s477_s13, 3 }
   0xf   : > { %s161_s17 = scalar_lea.vmem %s474_s2, %s373_s14  ;;  %s165_s25 = scalar_lea.vmem %s475_s3, %s373_s14 }
  0x10   : > { %v166_v1 = vld [vmem:[%s161_s17] sm:$0xff] }
  0x11   : > { %382 = vmatpush3.xpose.msra.mxu0 %v166_v1 }
  0x14   : > { %384 = vmatmul.mubr.f32.vlgmr.msra.gmra.mrb[0].mxu0 %v166_v1 }
  0xe7   : > { %v233_v3 = vpop.f32.mrb[0].mxu0 }
  0xe8   : > { %v385_v4 = vpop.f32.mrb[1].mxu0  ;;  %v240_v5 = vsel %vm239_vm1, %v233_v3, inf  ;;  %v376_v7 = vadd.f32 -0.5, %v233_v3 }
  0xe9   : > { %v242_v6 = vsel %vm241_vm2, %v240_v5, inf }
  0xea   : > { %243 = vmin.xlane.f32.xlu0 %v242_v6  ;;  %v252_v8 = vmul.f32 -2.0, %v376_v7  ;;  %v272_v9 = vmul.f32 50.0, %v376_v7 }
  0xec   : > { %v254_v10 = vand.u32 2147483647, %v252_v8  ;;  %v274_v11 = vand.u32 2147483647, %v272_v9  ;;  %v273_v37 = vmax.f32 %v272_v9, 0.0  ;;  %v253_v38 = vmax.f32 %v252_v8, 0.0 }
  0xee   : > { %v255_v12 = vsub.f32 0.0, %v254_v10  ;;  %v275_v13 = vsub.f32 0.0, %v274_v11 }
  0xf0   : > { %v256_v14 = vmul.f32 1.442695, %v255_v12  ;;  %v276_v15 = vmul.f32 1.442695, %v275_v13 }
  0xf2   : > { %398 = vpow2.f32 %v256_v14 }
  0xf3   : > { %400 = vpow2.f32 %v276_v15 }
  0xfc   : > { %v399_v16 = vpop.eup %398 }
  0xfd   : > { %v401_v17 = vpop.eup %400  ;;  %v258_v18 = vadd.f32 1.0, %v399_v16  ;;  %v261_v21 = vmul.f32 -0.5, %v399_v16  ;;  %v264_v27 = vand.u32 2147483647, %v399_v16 }
  0xfe   : > { %v278_v19 = vadd.f32 1.0, %v401_v17  ;;  %v281_v20 = vmul.f32 -0.5, %v401_v17  ;;  %v284_v26 = vand.u32 2147483647, %v401_v17 }
  0xff   : > { %402 = vlog2.f32 %v258_v18  ;;  %v262_v25 = vadd.f32 1.0, %v261_v21  ;;  %vm265_vm4 = vcmp.lt.f32.partialorder %v264_v27, 0.0004427343 }
 0x100   : > { %404 = vlog2.f32 %v278_v19  ;;  %v282_v24 = vadd.f32 1.0, %v281_v20  ;;  %vm285_vm3 = vcmp.lt.f32.partialorder %v284_v26, 0.0004427343 }
 0x101   : > { %v263_v31 = vmul.f32 %v399_v16, %v262_v25 }
 0x102   : > { %v283_v30 = vmul.f32 %v401_v17, %v282_v24 }
 0x109   : > { %v403_v22 = vpop.eup %402 }
 0x10a   : > { %v405_v23 = vpop.eup %404  ;;  %v260_v29 = vmul.f32 0.6931472, %v403_v22 }
 0x10b   : > { %v280_v28 = vmul.f32 0.6931472, %v405_v23 }
 0x10c   : > { %v266_v34 = vsel %vm265_vm4, %v263_v31, %v260_v29 }
 0x10d   : > { %v286_v33 = vsel %vm285_vm3, %v283_v30, %v280_v28  ;;  %v267_v40 = vadd.f32 %v266_v34, %v253_v38 }
 0x10e   : > { %v287_v39 = vadd.f32 %v286_v33, %v273_v37 }
 0x10f   : > { %v268_v45 = vmul.f32 %v267_v40, %v237_v2 }
 0x111   : > { %v269_v46 = vsel %vm241_vm2, %v268_v45, 0.0 }
 0x177   : > { %v244_v32 = vpop.xlane.xlu0 %243 }
 0x178   : > { %v375_v35 = vadd.f32 -0.05, %v244_v32 }
 0x17a   : > { %vm246_vm5 = vcmp.gt.f32.partialorder %v233_v3, %v375_v35 }
 0x17b   : > { %v247_v41 = vsel %vm246_vm5, %v238_v36, 0.0 }
 0x17c   : > { %v248_v42 = vsel %vm241_vm2, %v247_v41, 0.0  ;;  %v288_v43 = vmul.f32 %v287_v39, %v247_v41 }
 0x17d   : > { %249 = vadd.xlane.f32.xlu0 %v248_v42 }
 0x17e   : > { %v289_v44 = vsel %vm241_vm2, %v288_v43, 0.0 }
 0x17f   : > { %290 = vadd.xlane.f32.xlu1 %v289_v44 }
 0x183   : > { %270 = vadd.xlane.f32.xlu1 %v269_v46 }
 0x20a   : > { %v250_v47 = vpop.xlane.xlu0 %249 }
 0x20b   : > { %v293_v48 = vmax.f32 %v250_v47, 1.0  ;;  %vm296_vm7 = vcmp.gt.f32.partialorder %v250_v47, 0.0 }
 0x20c   : > { %v291_v49 = vpop.xlane.xlu1 %290 }
 0x20d   : > { %406 = vrcp.f32 %v293_v48  ;;  %v292_v50 = vmul.f32 0.04, %v291_v49 }
 0x210   : > { %v271_v53 = vpop.xlane.xlu1 %270 }
 0x217   : > { %v407_v51 = vpop.eup %406 }
 0x218   : > { %v295_v52 = vmul.f32 %v407_v51, %v292_v50 }
 0x21a   : > { %v297_v54 = vadd.f32 %v295_v52, %v271_v53 }
 0x21c   : > { %v298_v55 = vsel %vm296_vm7, %v297_v54, 0.0 }
 0x21d   : > { %v300_v56 = vsel %vm299_vm6, %v298_v55, 0.0 }
 0x21e   : > { %301 = vadd.xlane.f32.xlu0 %v300_v56 }
 0x2ab   : > { %v302_v57 = vpop.xlane.xlu0 %301 }
 0x2ac   : > { %v303_v58 = vrot.slane %v302_v57, 4 }
 0x2ae   : > { %v304_v59 = vadd.f32 %v303_v58, %v302_v57 }
 0x2b0   : > { %v305_v60 = vrot.slane %v304_v59, 2 }
 0x2b2   : > { %v306_v61 = vadd.f32 %v305_v60, %v304_v59 }
 0x2b4   : > { %v307_v62 = vrot.slane %v306_v61, 1 }
 0x2b6   : > { %v308_v63 = vadd.f32 %v307_v62, %v306_v61 }
 0x2b8   : > { %386 = vpush %v308_v63 }
 0x2e9   : > { %s387_s22 = spop %386 }
 0x2ea   : > { %s312_s26 = smul.f32 0.125, %s387_s22 }
 0x2ec   : > { %v313_v0 = vstv %s312_s26 }
 0x2ed   : > { %314 = vst [vmem:[%s165_s25] sm:$0xff] %v313_v0 }
 0x2ee PF: > { %s13_s12 = sadd.s32 1, %s414_s12  }
 0x2ef   : > { %p10_p4 = scmp.ge.s32.totalorder %s13_s12, 5  }
 0x2f1   :  { %12 = sbr.rel (!%p10_p4) target bundleno = 1 (0x1), region = 62 }

</bundles_post_ra>
